<compile_context>
chip_gen: v6e
topology: v6e:2x2x1
jax: 0.10.0
libtpu: 0.0.40
codegen_flags: <defaults>
</compile_context>

<pallas_src>
import functools

import jax
import jax.numpy as jnp
import numpy as np
from jax.experimental import pallas as pl
from jax.experimental.pallas import tpu as pltpu


def _leaky_relu(x, slope=0.2):
    return jnp.where(x >= 0, x, slope * x)


def _round_up(a, m):
    return ((a + m - 1) // m) * m


def rnn_mlp_kernel(T, H,
                   x_ref,                       # (TB, XS)   lane-dense flattened sequence
                   wihbd_ref, brnn_ref,         # (XS, T*H), (1, T*H)
                   whh_ref,                     # (H, H)     f32
                   w1_ref, b1_ref,              # (H, 256), (1, 256)    (BN folded in)
                   w2_ref, b2_ref,              # (256, 128), (1, 128)  (BN folded, padded 64->128)
                   w3_ref, b3_ref,              # (128, Cp), (1, Cp)    (lane-dense Cp)
                   out_ref,                     # (TB, Cp)
                   xp_ref):                     # VMEM scratch (T, TB, H) f32
    acc = jnp.float32
    cd = w1_ref.dtype            # MXU operand dtype for the MLP head (f32 or bf16)

    # ---- Whole-sequence input projection as ONE lane-dense matmul ---------------
    xp = jnp.dot(x_ref[...], wihbd_ref[...],
                 preferred_element_type=acc) + brnn_ref[...]        # (TB, T*H) f32
    # Stash time-major chunks in VMEM scratch: the serial recurrence then reads
    # sublane-aligned (TB, H) slabs via a leading index (no lane shifting on the
    # latency-critical chain), and the (TB, T*H) value's live range ends here.
    for t in range(T):
        xp_ref[t] = xp[:, t * H:(t + 1) * H]

    # ---- Fully unrolled recurrence: h_t = tanh(xp_t + h_{t-1} @ Whh) -------------
    # Kept in f32 (no per-step casts on the serial MXU->VPU-add->EUP-tanh chain;
    # v5e has no bf16 VPU/EUP and the 32x32 matmul gains nothing from bf16).
    whh = whh_ref[...]
    h = jnp.tanh(xp_ref[0])
    for t in range(1, T):
        h = jnp.tanh(xp_ref[t] + jnp.dot(h, whh, preferred_element_type=acc))

    # ---- MLP head (Dropout = identity, BN folded, middle layer padded 64->128) ---
    z1 = _leaky_relu(jnp.dot(h.astype(cd), w1_ref[...],
                             preferred_element_type=acc) + b1_ref[...])
    z2 = _leaky_relu(jnp.dot(z1.astype(cd), w2_ref[...],
                             preferred_element_type=acc) + b2_ref[...])
    out = jnp.dot(z2.astype(cd), w3_ref[...],
                  preferred_element_type=acc) + b3_ref[...]
    out_ref[...] = out.astype(out_ref.dtype)


def classification_with_rnns_forward(x, params, *, block_b=1024,
                                     compute_dtype=jnp.float32):
    """x: (B, T, S) float32. Returns logits (B, category) float32."""
    B, T, S = x.shape
    H = params["whh"].shape[0]
    C = params["w3"].shape[1]
    f32 = jnp.float32

    n1 = params["w1"].shape[1]                      # 256
    n2 = params["w2"].shape[1]                      # 64
    n2_p = max(128, _round_up(n2, 128))             # pad 64 -> 128 (lane-dense)
    C_pad = max(128, _round_up(C, 128))             # lane-dense output width

    # ---- Host-side prep: fold BatchNorm into the Linear layers ------------------
    w1 = (params["w1"] * params["s1"]).astype(compute_dtype)               # (H, 256)
    b1 = (params["b1"] * params["s1"] + params["t1"]).astype(f32)          # (1, 256)
    w2 = jnp.zeros((n1, n2_p), f32).at[:, :n2].set(
        params["w2"] * params["s2"]).astype(compute_dtype)                 # (256, 128)
    b2 = jnp.zeros((1, n2_p), f32).at[:, :n2].set(
        params["b2"] * params["s2"] + params["t2"])                        # (1, 128)
    w3 = jnp.zeros((n2_p, C_pad), f32).at[:n2, :C].set(
        params["w3"]).astype(compute_dtype)                                # (128, Cp)
    b3 = jnp.zeros((1, C_pad), f32).at[:, :C].set(params["b3"])            # (1, Cp)

    # Block-diagonal input-projection weight: x_flat (B, XS) @ wih_bd (XS, T*H)
    # computes all timestep projections in one lane-dense matmul inside the kernel.
    TS, TH = T * S, T * H
    XS = max(128, _round_up(TS, 128))
    wih_bd = jnp.zeros((XS, TH), f32)
    for t in range(T):
        wih_bd = wih_bd.at[t * S:(t + 1) * S, t * H:(t + 1) * H].set(params["wih"])
    wih_bd = wih_bd.astype(compute_dtype)
    brnn = jnp.tile(params["b_rnn"].astype(f32), (1, T))                   # (1, T*H)
    whh = params["whh"].astype(f32)                                        # recurrence stays f32

    # ---- Batch tiling: big lane-dense blocks; >=2 grid steps when the batch allows
    # so ("parallel",) shards across v7x's 2 TensorCores. VMEM is never the limit here.
    B_r = _round_up(B, 8)
    if B_r <= 16:
        TB = B_r
    else:
        n_blocks = max(2, pl.cdiv(B_r, block_b))
        TB = _round_up(pl.cdiv(B_r, n_blocks), 8)
    B_pad = _round_up(B, TB)
    grid = (B_pad // TB,)

    # Flatten the sequence and zero-pad rows/lanes -> lane-dense streamed input block.
    x_flat = jnp.zeros((B_pad, XS), compute_dtype).at[:B, :TS].set(
        x.reshape(B, TS).astype(compute_dtype))

    full2 = lambda a: pl.BlockSpec(a.shape, lambda i: (0, 0))
    in_specs = [
        pl.BlockSpec((TB, XS), lambda i: (i, 0)),     # x_flat (lane-dense)
        full2(wih_bd), full2(brnn), full2(whh),
        full2(w1), full2(b1), full2(w2), full2(b2), full2(w3), full2(b3),
    ]
    out_specs = pl.BlockSpec((TB, C_pad), lambda i: (i, 0))

    weights = (wih_bd, brnn, whh, w1, b1, w2, b2, w3, b3)
    weight_bytes = int(sum(int(a.size) * a.dtype.itemsize for a in weights))
    x_item = jnp.dtype(compute_dtype).itemsize
    flops = 2 * B_pad * (XS * TH + (T - 1) * H * H + H * n1 + n1 * n2_p + n2_p * C_pad)
    cost = pl.CostEstimate(
        flops=int(flops),
        transcendentals=int(B_pad * T * H),
        bytes_accessed=int(x_item * B_pad * XS + weight_bytes + 4 * B_pad * C_pad),
    )

    out = pl.pallas_call(
        functools.partial(rnn_mlp_kernel, T, H),
        out_shape=jax.ShapeDtypeStruct((B_pad, C_pad), jnp.float32),
        grid=grid,
        in_specs=in_specs,
        out_specs=out_specs,
        scratch_shapes=[pltpu.VMEM((T, TB, H), jnp.float32)],
        compiler_params=pltpu.CompilerParams(
            dimension_semantics=("parallel",)),
        cost_estimate=cost,
    )(x_flat, wih_bd, brnn, whh, w1, b1, w2, b2, w3, b3)

    return out[:B, :C]


def init_params(key, sensors, hidden, category):
    """Deterministic parameter init matching the module's shapes (eval mode)."""
    ks = jax.random.split(key, 18)
    u = lambda k, shape, s: jax.random.uniform(k, shape, jnp.float32, -s, s)

    H = hidden
    k_rnn = 1.0 / np.sqrt(H)
    # nn.RNN stores weights as (H, in); keep them transposed for x @ W.
    wih = u(ks[0], (sensors, H), k_rnn)
    whh = u(ks[1], (H, H), k_rnn)
    b_rnn = u(ks[2], (1, H), k_rnn) + u(ks[3], (1, H), k_rnn)   # b_ih + b_hh

    def linear(kw, kb, fan_in, fan_out):
        s = 1.0 / np.sqrt(fan_in)
        return u(kw, (fan_in, fan_out), s), u(kb, (1, fan_out), s)

    w1, b1 = linear(ks[4], ks[5], H, 256)
    w2, b2 = linear(ks[6], ks[7], 256, 64)
    w3, b3 = linear(ks[8], ks[9], 64, category)

    def bn_fold(kg, kb, km, kv, n, eps=1e-5):
        gamma = 1.0 + 0.1 * jax.random.normal(kg, (1, n), jnp.float32)
        beta = 0.1 * jax.random.normal(kb, (1, n), jnp.float32)
        rmean = 0.1 * jax.random.normal(km, (1, n), jnp.float32)
        rvar = 1.0 + 0.1 * jax.random.uniform(kv, (1, n), jnp.float32)
        scale = gamma / jnp.sqrt(rvar + eps)
        shift = beta - rmean * scale
        return scale, shift

    s1, t1 = bn_fold(ks[10], ks[11], ks[12], ks[13], 256)
    s2, t2 = bn_fold(ks[14], ks[15], ks[16], ks[17], 64)

    return dict(wih=wih, whh=whh, b_rnn=b_rnn,
                w1=w1, b1=b1, s1=s1, t1=t1,
                w2=w2, b2=b2, s2=s2, t2=t2,
                w3=w3, b3=b3)


def reference_forward(x, p):
    """Pure-JAX reference of the same eval-mode forward (unfolded BN)."""
    B, T, _ = x.shape
    H = p["whh"].shape[0]
    h = jnp.zeros((B, H), jnp.float32)
    for t in range(T):
        h = jnp.tanh(x[:, t, :] @ p["wih"] + h @ p["whh"] + p["b_rnn"])
    z1 = _leaky_relu((h @ p["w1"] + p["b1"]) * p["s1"] + p["t1"])
    z2 = _leaky_relu((z1 @ p["w2"] + p["b2"]) * p["s2"] + p["t2"])
    return z2 @ p["w3"] + p["b3"]


if __name__ == "__main__":
    # Small shapes consistent with the module: batch=2, seq=8, sensors=4,
    # hidden_size=32, category=10.
    B, T, S, H, C = 2, 8, 4, 32, 10

    key = jax.random.PRNGKey(0)
    k_x, k_p = jax.random.split(key)
    x = jax.random.normal(k_x, (B, T, S), jnp.float32)
    params = init_params(k_p, S, H, C)

    out = classification_with_rnns_forward(x, params)
    out = jax.block_until_ready(out)

    ref = reference_forward(x, params)
    np.testing.assert_allclose(np.asarray(out), np.asarray(ref), rtol=1e-4, atol=1e-4)

    print("KERNEL_OK")
</pallas_src>

<mosaic_0001>
module attributes {stable_mosaic.version = 11 : i64} {
  func.func @rnn_mlp_kernel(%arg0: i32, %arg1: memref<8x128xf32, #tpu.memory_space<vmem>>, %arg2: memref<128x256xf32, #tpu.memory_space<vmem>>, %arg3: memref<1x256xf32, #tpu.memory_space<vmem>>, %arg4: memref<32x32xf32, #tpu.memory_space<vmem>>, %arg5: memref<32x256xf32, #tpu.memory_space<vmem>>, %arg6: memref<1x256xf32, #tpu.memory_space<vmem>>, %arg7: memref<256x128xf32, #tpu.memory_space<vmem>>, %arg8: memref<1x128xf32, #tpu.memory_space<vmem>>, %arg9: memref<128x128xf32, #tpu.memory_space<vmem>>, %arg10: memref<1x128xf32, #tpu.memory_space<vmem>>, %arg11: memref<8x128xf32, #tpu.memory_space<vmem>>, %arg12: memref<8x8x32xf32, #tpu.memory_space<vmem>>) attributes {dimension_semantics = [#tpu.dimension_semantics<parallel>], iteration_bounds = array<i64: 1>, scalar_prefetch = 0 : i64, scratch_operands = 1 : i64, tpu.core_type = #tpu.core_type<tc>, window_params = [{transform_indices = @transform_0, window_bounds = array<i64: 8, 128>}, {pipeline_mode = #tpu.pipeline_mode<synchronous>, transform_indices = @transform_1, window_bounds = array<i64: 128, 256>}, {pipeline_mode = #tpu.pipeline_mode<synchronous>, transform_indices = @transform_2, window_bounds = array<i64: 1, 256>}, {pipeline_mode = #tpu.pipeline_mode<synchronous>, transform_indices = @transform_3, window_bounds = array<i64: 32, 32>}, {pipeline_mode = #tpu.pipeline_mode<synchronous>, transform_indices = @transform_4, window_bounds = array<i64: 32, 256>}, {pipeline_mode = #tpu.pipeline_mode<synchronous>, transform_indices = @transform_5, window_bounds = array<i64: 1, 256>}, {pipeline_mode = #tpu.pipeline_mode<synchronous>, transform_indices = @transform_6, window_bounds = array<i64: 256, 128>}, {pipeline_mode = #tpu.pipeline_mode<synchronous>, transform_indices = @transform_7, window_bounds = array<i64: 1, 128>}, {pipeline_mode = #tpu.pipeline_mode<synchronous>, transform_indices = @transform_8, window_bounds = array<i64: 128, 128>}, {pipeline_mode = #tpu.pipeline_mode<synchronous>, transform_indices = @transform_9, window_bounds = array<i64: 1, 128>}, {transform_indices = @transform_10, window_bounds = array<i64: 8, 128>}]} {
    %c0 = arith.constant 0 : index
    %c0_0 = arith.constant 0 : index
    %0 = vector.load %arg1[%c0, %c0_0] : memref<8x128xf32, #tpu.memory_space<vmem>>, vector<8x128xf32>
    %c0_1 = arith.constant 0 : index
    %c0_2 = arith.constant 0 : index
    %1 = vector.load %arg2[%c0_1, %c0_2] : memref<128x256xf32, #tpu.memory_space<vmem>>, vector<128x256xf32>
    %cst = arith.constant dense<0.000000e+00> : vector<8x256xf32>
    %2 = tpu.matmul %0, %1, %cst {dimension_numbers = #tpu.dot_dimension_numbers<[1], [0], [0], [1], [0, 0, 1, 1], [], []>} : vector<8x128xf32>, vector<128x256xf32>, vector<8x256xf32> -> vector<8x256xf32>
    %c0_3 = arith.constant 0 : index
    %c0_4 = arith.constant 0 : index
    %3 = vector.load %arg3[%c0_3, %c0_4] : memref<1x256xf32, #tpu.memory_space<vmem>>, vector<1x256xf32>
    %4 = vector.broadcast %3 : vector<1x256xf32> to vector<8x256xf32>
    %5 = arith.addf %2, %4 : vector<8x256xf32>
    %6 = vector.extract_strided_slice %5 {offsets = [0, 0], sizes = [8, 32], strides = [1, 1]} : vector<8x256xf32> to vector<8x32xf32>
    %c0_5 = arith.constant 0 : index
    %c0_6 = arith.constant 0 : index
    %c0_7 = arith.constant 0 : index
    %7 = vector.load %arg12[%c0_5, %c0_6, %c0_7] : memref<8x8x32xf32, #tpu.memory_space<vmem>>, vector<1x8x32xf32>
    %8 = vector.shape_cast %7 : vector<1x8x32xf32> to vector<8x32xf32>
    %9 = vector.shape_cast %6 : vector<8x32xf32> to vector<1x8x32xf32>
    tpu.vector_store %arg12[%c0_5, %c0_6, %c0_7], %9 {strides = array<i32>} : memref<8x8x32xf32, #tpu.memory_space<vmem>>, vector<1x8x32xf32>,
    %10 = vector.extract_strided_slice %5 {offsets = [0, 32], sizes = [8, 32], strides = [1, 1]} : vector<8x256xf32> to vector<8x32xf32>
    %c1 = arith.constant 1 : index
    %c0_8 = arith.constant 0 : index
    %c0_9 = arith.constant 0 : index
    %11 = vector.load %arg12[%c1, %c0_8, %c0_9] : memref<8x8x32xf32, #tpu.memory_space<vmem>>, vector<1x8x32xf32>
    %12 = vector.shape_cast %11 : vector<1x8x32xf32> to vector<8x32xf32>
    %13 = vector.shape_cast %10 : vector<8x32xf32> to vector<1x8x32xf32>
    tpu.vector_store %arg12[%c1, %c0_8, %c0_9], %13 {strides = array<i32>} : memref<8x8x32xf32, #tpu.memory_space<vmem>>, vector<1x8x32xf32>,
    %14 = vector.extract_strided_slice %5 {offsets = [0, 64], sizes = [8, 32], strides = [1, 1]} : vector<8x256xf32> to vector<8x32xf32>
    %c2 = arith.constant 2 : index
    %c0_10 = arith.constant 0 : index
    %c0_11 = arith.constant 0 : index
    %15 = vector.load %arg12[%c2, %c0_10, %c0_11] : memref<8x8x32xf32, #tpu.memory_space<vmem>>, vector<1x8x32xf32>
    %16 = vector.shape_cast %15 : vector<1x8x32xf32> to vector<8x32xf32>
    %17 = vector.shape_cast %14 : vector<8x32xf32> to vector<1x8x32xf32>
    tpu.vector_store %arg12[%c2, %c0_10, %c0_11], %17 {strides = array<i32>} : memref<8x8x32xf32, #tpu.memory_space<vmem>>, vector<1x8x32xf32>,
    %18 = vector.extract_strided_slice %5 {offsets = [0, 96], sizes = [8, 32], strides = [1, 1]} : vector<8x256xf32> to vector<8x32xf32>
    %c3 = arith.constant 3 : index
    %c0_12 = arith.constant 0 : index
    %c0_13 = arith.constant 0 : index
    %19 = vector.load %arg12[%c3, %c0_12, %c0_13] : memref<8x8x32xf32, #tpu.memory_space<vmem>>, vector<1x8x32xf32>
    %20 = vector.shape_cast %19 : vector<1x8x32xf32> to vector<8x32xf32>
    %21 = vector.shape_cast %18 : vector<8x32xf32> to vector<1x8x32xf32>
    tpu.vector_store %arg12[%c3, %c0_12, %c0_13], %21 {strides = array<i32>} : memref<8x8x32xf32, #tpu.memory_space<vmem>>, vector<1x8x32xf32>,
    %22 = vector.extract_strided_slice %5 {offsets = [0, 128], sizes = [8, 32], strides = [1, 1]} : vector<8x256xf32> to vector<8x32xf32>
    %c4 = arith.constant 4 : index
    %c0_14 = arith.constant 0 : index
    %c0_15 = arith.constant 0 : index
    %23 = vector.load %arg12[%c4, %c0_14, %c0_15] : memref<8x8x32xf32, #tpu.memory_space<vmem>>, vector<1x8x32xf32>
    %24 = vector.shape_cast %23 : vector<1x8x32xf32> to vector<8x32xf32>
    %25 = vector.shape_cast %22 : vector<8x32xf32> to vector<1x8x32xf32>
    tpu.vector_store %arg12[%c4, %c0_14, %c0_15], %25 {strides = array<i32>} : memref<8x8x32xf32, #tpu.memory_space<vmem>>, vector<1x8x32xf32>,
    %26 = vector.extract_strided_slice %5 {offsets = [0, 160], sizes = [8, 32], strides = [1, 1]} : vector<8x256xf32> to vector<8x32xf32>
    %c5 = arith.constant 5 : index
    %c0_16 = arith.constant 0 : index
    %c0_17 = arith.constant 0 : index
    %27 = vector.load %arg12[%c5, %c0_16, %c0_17] : memref<8x8x32xf32, #tpu.memory_space<vmem>>, vector<1x8x32xf32>
    %28 = vector.shape_cast %27 : vector<1x8x32xf32> to vector<8x32xf32>
    %29 = vector.shape_cast %26 : vector<8x32xf32> to vector<1x8x32xf32>
    tpu.vector_store %arg12[%c5, %c0_16, %c0_17], %29 {strides = array<i32>} : memref<8x8x32xf32, #tpu.memory_space<vmem>>, vector<1x8x32xf32>,
    %30 = vector.extract_strided_slice %5 {offsets = [0, 192], sizes = [8, 32], strides = [1, 1]} : vector<8x256xf32> to vector<8x32xf32>
    %c6 = arith.constant 6 : index
    %c0_18 = arith.constant 0 : index
    %c0_19 = arith.constant 0 : index
    %31 = vector.load %arg12[%c6, %c0_18, %c0_19] : memref<8x8x32xf32, #tpu.memory_space<vmem>>, vector<1x8x32xf32>
    %32 = vector.shape_cast %31 : vector<1x8x32xf32> to vector<8x32xf32>
    %33 = vector.shape_cast %30 : vector<8x32xf32> to vector<1x8x32xf32>
    tpu.vector_store %arg12[%c6, %c0_18, %c0_19], %33 {strides = array<i32>} : memref<8x8x32xf32, #tpu.memory_space<vmem>>, vector<1x8x32xf32>,
    %34 = vector.extract_strided_slice %5 {offsets = [0, 224], sizes = [8, 32], strides = [1, 1]} : vector<8x256xf32> to vector<8x32xf32>
    %c7 = arith.constant 7 : index
    %c0_20 = arith.constant 0 : index
    %c0_21 = arith.constant 0 : index
    %35 = vector.load %arg12[%c7, %c0_20, %c0_21] : memref<8x8x32xf32, #tpu.memory_space<vmem>>, vector<1x8x32xf32>
    %36 = vector.shape_cast %35 : vector<1x8x32xf32> to vector<8x32xf32>
    %37 = vector.shape_cast %34 : vector<8x32xf32> to vector<1x8x32xf32>
    tpu.vector_store %arg12[%c7, %c0_20, %c0_21], %37 {strides = array<i32>} : memref<8x8x32xf32, #tpu.memory_space<vmem>>, vector<1x8x32xf32>,
    %c0_22 = arith.constant 0 : index
    %c0_23 = arith.constant 0 : index
    %38 = vector.load %arg4[%c0_22, %c0_23] : memref<32x32xf32, #tpu.memory_space<vmem>>, vector<32x32xf32>
    %c0_24 = arith.constant 0 : index
    %c0_25 = arith.constant 0 : index
    %c0_26 = arith.constant 0 : index
    %39 = vector.load %arg12[%c0_24, %c0_25, %c0_26] : memref<8x8x32xf32, #tpu.memory_space<vmem>>, vector<1x8x32xf32>
    %40 = vector.shape_cast %39 : vector<1x8x32xf32> to vector<8x32xf32>
    %41 = math.tanh %40 : vector<8x32xf32>
    %c1_27 = arith.constant 1 : index
    %c0_28 = arith.constant 0 : index
    %c0_29 = arith.constant 0 : index
    %42 = vector.load %arg12[%c1_27, %c0_28, %c0_29] : memref<8x8x32xf32, #tpu.memory_space<vmem>>, vector<1x8x32xf32>
    %43 = vector.shape_cast %42 : vector<1x8x32xf32> to vector<8x32xf32>
    %cst_30 = arith.constant dense<0.000000e+00> : vector<8x32xf32>
    %44 = tpu.matmul %41, %38, %cst_30 {dimension_numbers = #tpu.dot_dimension_numbers<[1], [0], [0], [1], [0, 0, 1, 1], [], []>} : vector<8x32xf32>, vector<32x32xf32>, vector<8x32xf32> -> vector<8x32xf32>
    %45 = arith.addf %43, %44 : vector<8x32xf32>
    %46 = math.tanh %45 : vector<8x32xf32>
    %c2_31 = arith.constant 2 : index
    %c0_32 = arith.constant 0 : index
    %c0_33 = arith.constant 0 : index
    %47 = vector.load %arg12[%c2_31, %c0_32, %c0_33] : memref<8x8x32xf32, #tpu.memory_space<vmem>>, vector<1x8x32xf32>
    %48 = vector.shape_cast %47 : vector<1x8x32xf32> to vector<8x32xf32>
    %cst_34 = arith.constant dense<0.000000e+00> : vector<8x32xf32>
    %49 = tpu.matmul %46, %38, %cst_34 {dimension_numbers = #tpu.dot_dimension_numbers<[1], [0], [0], [1], [0, 0, 1, 1], [], []>} : vector<8x32xf32>, vector<32x32xf32>, vector<8x32xf32> -> vector<8x32xf32>
    %50 = arith.addf %48, %49 : vector<8x32xf32>
    %51 = math.tanh %50 : vector<8x32xf32>
    %c3_35 = arith.constant 3 : index
    %c0_36 = arith.constant 0 : index
    %c0_37 = arith.constant 0 : index
    %52 = vector.load %arg12[%c3_35, %c0_36, %c0_37] : memref<8x8x32xf32, #tpu.memory_space<vmem>>, vector<1x8x32xf32>
    %53 = vector.shape_cast %52 : vector<1x8x32xf32> to vector<8x32xf32>
    %cst_38 = arith.constant dense<0.000000e+00> : vector<8x32xf32>
    %54 = tpu.matmul %51, %38, %cst_38 {dimension_numbers = #tpu.dot_dimension_numbers<[1], [0], [0], [1], [0, 0, 1, 1], [], []>} : vector<8x32xf32>, vector<32x32xf32>, vector<8x32xf32> -> vector<8x32xf32>
    %55 = arith.addf %53, %54 : vector<8x32xf32>
    %56 = math.tanh %55 : vector<8x32xf32>
    %c4_39 = arith.constant 4 : index
    %c0_40 = arith.constant 0 : index
    %c0_41 = arith.constant 0 : index
    %57 = vector.load %arg12[%c4_39, %c0_40, %c0_41] : memref<8x8x32xf32, #tpu.memory_space<vmem>>, vector<1x8x32xf32>
    %58 = vector.shape_cast %57 : vector<1x8x32xf32> to vector<8x32xf32>
    %cst_42 = arith.constant dense<0.000000e+00> : vector<8x32xf32>
    %59 = tpu.matmul %56, %38, %cst_42 {dimension_numbers = #tpu.dot_dimension_numbers<[1], [0], [0], [1], [0, 0, 1, 1], [], []>} : vector<8x32xf32>, vector<32x32xf32>, vector<8x32xf32> -> vector<8x32xf32>
    %60 = arith.addf %58, %59 : vector<8x32xf32>
    %61 = math.tanh %60 : vector<8x32xf32>
    %c5_43 = arith.constant 5 : index
    %c0_44 = arith.constant 0 : index
    %c0_45 = arith.constant 0 : index
    %62 = vector.load %arg12[%c5_43, %c0_44, %c0_45] : memref<8x8x32xf32, #tpu.memory_space<vmem>>, vector<1x8x32xf32>
    %63 = vector.shape_cast %62 : vector<1x8x32xf32> to vector<8x32xf32>
    %cst_46 = arith.constant dense<0.000000e+00> : vector<8x32xf32>
    %64 = tpu.matmul %61, %38, %cst_46 {dimension_numbers = #tpu.dot_dimension_numbers<[1], [0], [0], [1], [0, 0, 1, 1], [], []>} : vector<8x32xf32>, vector<32x32xf32>, vector<8x32xf32> -> vector<8x32xf32>
    %65 = arith.addf %63, %64 : vector<8x32xf32>
    %66 = math.tanh %65 : vector<8x32xf32>
    %c6_47 = arith.constant 6 : index
    %c0_48 = arith.constant 0 : index
    %c0_49 = arith.constant 0 : index
    %67 = vector.load %arg12[%c6_47, %c0_48, %c0_49] : memref<8x8x32xf32, #tpu.memory_space<vmem>>, vector<1x8x32xf32>
    %68 = vector.shape_cast %67 : vector<1x8x32xf32> to vector<8x32xf32>
    %cst_50 = arith.constant dense<0.000000e+00> : vector<8x32xf32>
    %69 = tpu.matmul %66, %38, %cst_50 {dimension_numbers = #tpu.dot_dimension_numbers<[1], [0], [0], [1], [0, 0, 1, 1], [], []>} : vector<8x32xf32>, vector<32x32xf32>, vector<8x32xf32> -> vector<8x32xf32>
    %70 = arith.addf %68, %69 : vector<8x32xf32>
    %71 = math.tanh %70 : vector<8x32xf32>
    %c7_51 = arith.constant 7 : index
    %c0_52 = arith.constant 0 : index
    %c0_53 = arith.constant 0 : index
    %72 = vector.load %arg12[%c7_51, %c0_52, %c0_53] : memref<8x8x32xf32, #tpu.memory_space<vmem>>, vector<1x8x32xf32>
    %73 = vector.shape_cast %72 : vector<1x8x32xf32> to vector<8x32xf32>
    %cst_54 = arith.constant dense<0.000000e+00> : vector<8x32xf32>
    %74 = tpu.matmul %71, %38, %cst_54 {dimension_numbers = #tpu.dot_dimension_numbers<[1], [0], [0], [1], [0, 0, 1, 1], [], []>} : vector<8x32xf32>, vector<32x32xf32>, vector<8x32xf32> -> vector<8x32xf32>
    %75 = arith.addf %73, %74 : vector<8x32xf32>
    %76 = math.tanh %75 : vector<8x32xf32>
    %c0_55 = arith.constant 0 : index
    %c0_56 = arith.constant 0 : index
    %77 = vector.load %arg5[%c0_55, %c0_56] : memref<32x256xf32, #tpu.memory_space<vmem>>, vector<32x256xf32>
    %cst_57 = arith.constant dense<0.000000e+00> : vector<8x256xf32>
    %78 = tpu.matmul %76, %77, %cst_57 {dimension_numbers = #tpu.dot_dimension_numbers<[1], [0], [0], [1], [0, 0, 1, 1], [], []>} : vector<8x32xf32>, vector<32x256xf32>, vector<8x256xf32> -> vector<8x256xf32>
    %c0_58 = arith.constant 0 : index
    %c0_59 = arith.constant 0 : index
    %79 = vector.load %arg6[%c0_58, %c0_59] : memref<1x256xf32, #tpu.memory_space<vmem>>, vector<1x256xf32>
    %80 = vector.broadcast %79 : vector<1x256xf32> to vector<8x256xf32>
    %81 = arith.addf %78, %80 : vector<8x256xf32>
    %cst_60 = arith.constant 0.000000e+00 : f32
    %82 = vector.broadcast %cst_60 : f32 to vector<8x256xf32>
    %83 = arith.cmpf oge, %81, %82 : vector<8x256xf32>
    %cst_61 = arith.constant 2.000000e-01 : f32
    %84 = vector.broadcast %cst_61 : f32 to vector<8x256xf32>
    %85 = arith.mulf %84, %81 : vector<8x256xf32>
    %86 = arith.select %83, %81, %85 : vector<8x256xi1>, vector<8x256xf32>
    %c0_62 = arith.constant 0 : index
    %c0_63 = arith.constant 0 : index
    %87 = vector.load %arg7[%c0_62, %c0_63] : memref<256x128xf32, #tpu.memory_space<vmem>>, vector<256x128xf32>
    %cst_64 = arith.constant dense<0.000000e+00> : vector<8x128xf32>
    %88 = tpu.matmul %86, %87, %cst_64 {dimension_numbers = #tpu.dot_dimension_numbers<[1], [0], [0], [1], [0, 0, 1, 1], [], []>} : vector<8x256xf32>, vector<256x128xf32>, vector<8x128xf32> -> vector<8x128xf32>
    %c0_65 = arith.constant 0 : index
    %c0_66 = arith.constant 0 : index
    %89 = vector.load %arg8[%c0_65, %c0_66] : memref<1x128xf32, #tpu.memory_space<vmem>>, vector<1x128xf32>
    %90 = vector.broadcast %89 : vector<1x128xf32> to vector<8x128xf32>
    %91 = arith.addf %88, %90 : vector<8x128xf32>
    %cst_67 = arith.constant 0.000000e+00 : f32
    %92 = vector.broadcast %cst_67 : f32 to vector<8x128xf32>
    %93 = arith.cmpf oge, %91, %92 : vector<8x128xf32>
    %cst_68 = arith.constant 2.000000e-01 : f32
    %94 = vector.broadcast %cst_68 : f32 to vector<8x128xf32>
    %95 = arith.mulf %94, %91 : vector<8x128xf32>
    %96 = arith.select %93, %91, %95 : vector<8x128xi1>, vector<8x128xf32>
    %c0_69 = arith.constant 0 : index
    %c0_70 = arith.constant 0 : index
    %97 = vector.load %arg9[%c0_69, %c0_70] : memref<128x128xf32, #tpu.memory_space<vmem>>, vector<128x128xf32>
    %cst_71 = arith.constant dense<0.000000e+00> : vector<8x128xf32>
    %98 = tpu.matmul %96, %97, %cst_71 {dimension_numbers = #tpu.dot_dimension_numbers<[1], [0], [0], [1], [0, 0, 1, 1], [], []>} : vector<8x128xf32>, vector<128x128xf32>, vector<8x128xf32> -> vector<8x128xf32>
    %c0_72 = arith.constant 0 : index
    %c0_73 = arith.constant 0 : index
    %99 = vector.load %arg10[%c0_72, %c0_73] : memref<1x128xf32, #tpu.memory_space<vmem>>, vector<1x128xf32>
    %100 = vector.broadcast %99 : vector<1x128xf32> to vector<8x128xf32>
    %101 = arith.addf %98, %100 : vector<8x128xf32>
    %c0_74 = arith.constant 0 : index
    %c0_75 = arith.constant 0 : index
    %102 = vector.load %arg11[%c0_74, %c0_75] : memref<8x128xf32, #tpu.memory_space<vmem>>, vector<8x128xf32>
    tpu.vector_store %arg11[%c0_74, %c0_75], %101 {strides = array<i32>} : memref<8x128xf32, #tpu.memory_space<vmem>>, vector<8x128xf32>,
    return
  }
  func.func @transform_0(%arg0: i32) -> (i32, i32) {
    %c0_i32 = arith.constant 0 : i32
    %c0_i32_0 = arith.constant 0 : i32
    return %arg0, %c0_i32 : i32, i32
  }
  func.func @transform_1(%arg0: i32) -> (i32, i32) {
    %c0_i32 = arith.constant 0 : i32
    %c0_i32_0 = arith.constant 0 : i32
    %c0_i32_1 = arith.constant 0 : i32
    return %c0_i32, %c0_i32_0 : i32, i32
  }
  func.func @transform_2(%arg0: i32) -> (i32, i32) {
    %c0_i32 = arith.constant 0 : i32
    %c0_i32_0 = arith.constant 0 : i32
    %c0_i32_1 = arith.constant 0 : i32
    return %c0_i32, %c0_i32_0 : i32, i32
  }
  func.func @transform_3(%arg0: i32) -> (i32, i32) {
    %c0_i32 = arith.constant 0 : i32
    %c0_i32_0 = arith.constant 0 : i32
    %c0_i32_1 = arith.constant 0 : i32
    return %c0_i32, %c0_i32_0 : i32, i32
  }
  func.func @transform_4(%arg0: i32) -> (i32, i32) {
    %c0_i32 = arith.constant 0 : i32
    %c0_i32_0 = arith.constant 0 : i32
    %c0_i32_1 = arith.constant 0 : i32
    return %c0_i32, %c0_i32_0 : i32, i32
  }
  func.func @transform_5(%arg0: i32) -> (i32, i32) {
    %c0_i32 = arith.constant 0 : i32
    %c0_i32_0 = arith.constant 0 : i32
    %c0_i32_1 = arith.constant 0 : i32
    return %c0_i32, %c0_i32_0 : i32, i32
  }
  func.func @transform_6(%arg0: i32) -> (i32, i32) {
    %c0_i32 = arith.constant 0 : i32
    %c0_i32_0 = arith.constant 0 : i32
    %c0_i32_1 = arith.constant 0 : i32
    return %c0_i32, %c0_i32_0 : i32, i32
  }
  func.func @transform_7(%arg0: i32) -> (i32, i32) {
    %c0_i32 = arith.constant 0 : i32
    %c0_i32_0 = arith.constant 0 : i32
    %c0_i32_1 = arith.constant 0 : i32
    return %c0_i32, %c0_i32_0 : i32, i32
  }
  func.func @transform_8(%arg0: i32) -> (i32, i32) {
    %c0_i32 = arith.constant 0 : i32
    %c0_i32_0 = arith.constant 0 : i32
    %c0_i32_1 = arith.constant 0 : i32
    return %c0_i32, %c0_i32_0 : i32, i32
  }
  func.func @transform_9(%arg0: i32) -> (i32, i32) {
    %c0_i32 = arith.constant 0 : i32
    %c0_i32_0 = arith.constant 0 : i32
    %c0_i32_1 = arith.constant 0 : i32
    return %c0_i32, %c0_i32_0 : i32, i32
  }
  func.func @transform_10(%arg0: i32) -> (i32, i32) {
    %c0_i32 = arith.constant 0 : i32
    %c0_i32_0 = arith.constant 0 : i32
    return %arg0, %c0_i32 : i32, i32
  }
}

</mosaic_0001>

<bundles_post_ra>
// kernel: tpu_custom_call.1
= control target key start
LH: loop header
LB: loop body
LE: loop exit
PB: predicated region body
PF: predicated region fallthrough
CT: control target
= control target key end

     0   :  { %15 = vsyncpa [#allocation4], 0  ;;  %s1751_s0 = inlined_call_operand.hbm [shape: f32[8,128], index: 0, kind: input, shape index: {}]   ;;  %s1752_s1 = inlined_call_operand.hbm [shape: f32[128,256], index: 1, kind: input, shape index: {}]   ;;  %s1753_s2 = inlined_call_operand.vmem [shape: f32[1,256], index: 2, kind: input, shape index: {}]   ;;  %s1754_s3 = inlined_call_operand.hbm [shape: f32[32,32], index: 3, kind: input, shape index: {}]   ;;  %s1755_s4 = inlined_call_operand.hbm [shape: f32[32,256], index: 4, kind: input, shape index: {}]   ;;  %s1756_s5 = inlined_call_operand.vmem [shape: f32[1,256], index: 5, kind: input, shape index: {}]   ;;  %s1757_s6 = inlined_call_operand.hbm [shape: f32[256,128], index: 6, kind: input, shape index: {}]   ;;  %s1758_s7 = inlined_call_operand.vmem [shape: f32[1,128], index: 7, kind: input, shape index: {}]   ;;  %s1759_s8 = inlined_call_operand.hbm [shape: f32[128,128], index: 8, kind: input, shape index: {}]   ;;  %s1760_s9 = inlined_call_operand.vmem [shape: f32[1,128], index: 9, kind: input, shape index: {}]   ;;  %s1761_s10 = inlined_call_operand.hbm [shape: f32[8,128], index: 10, kind: output, shape index: {}]  }
   0x1   :  { %16 = vsyncpa [#allocation7], 0 }
   0x2   :  { %17 = vsyncpa [#allocation10], 0 }
   0x3   :  { %18 = vsyncpa [#allocation13], 0 }
   0x4   :  { %19 = vsyncpa [#allocation5], 0  ;;  %s1521_s13 = smov [#allocation6]  }
   0x5   :  { %s35_s14 = sshll.u32 %s1521_s13, 4  ;;  %s36_s14 = int_to_ptr.vmem [resolvable:$true] %s35_s14 }
   0x6   :  { %s1379_s15 = scalar_lea.vmem %s36_s14, 4096  ;;  %p1384_p1 = scmp.lt.s32.totalorder %s36_s14, %s36_s14 }
   0x7   :  { %p1380_p0 = scmp.ne.s32.totalorder %s36_s14, %s1379_s15  ;;  %p1385_p2 = scmp.lt.s32.totalorder %s1379_s15, %s1379_s15 }
   0x9   :  { %p1386_p3 = por %p1385_p2, %p1384_p1 }
   0xb   :  { %p1387_p4 = pnand %p1386_p3, %p1380_p0 }
   0xd   :  { %1390 = shalt.err (!%p1387_p4)
}
   0xe   :  { %s1522_s16 = smov 256   ;;  %s1523_s17 = smov 16  }
   0xf   :  { %41 = dma.hbm_to_vmem [thread:$0]  %s1752_s1, 4096, %s36_s14, [#allocation7], %s1522_s16, %s1522_s16, %s1523_s17  }
  0x10   :  { %s1524_s20 = smov [#allocation9]   ;;  %s1525_s22 = smov [#allocation3]  }
  0x11   :  { %s61_s21 = sshll.u32 %s1524_s20, 4  ;;  %s26_s23 = sshll.u32 %s1525_s22, 4  ;;  %s62_s21 = int_to_ptr.vmem [resolvable:$true] %s61_s21  ;;  %s27_s23 = int_to_ptr.vmem [resolvable:$true] %s26_s23 }
  0x12   :  { %s1399_s24 = scalar_lea.vmem %s62_s21, 1024  ;;  %p1404_p6 = scmp.lt.s32.totalorder %s62_s21, %s62_s21 }
  0x13   :  { %p1400_p5 = scmp.ne.s32.totalorder %s62_s21, %s1399_s24  ;;  %p1405_p7 = scmp.lt.s32.totalorder %s1399_s24, %s1399_s24 }
  0x15   :  { %p1406_p8 = por %p1405_p7, %p1404_p6 }
  0x17   :  { %p1407_p9 = pnand %p1406_p8, %p1400_p5 }
  0x19   :  { %1410 = shalt.err (!%p1407_p9)
}
  0x1a   :  { %67 = dma.hbm_to_vmem [thread:$0]  %s1755_s4, 1024, %s62_s21, [#allocation10], %s1522_s16, %s1522_s16, %s1523_s17  }
  0x1b   :  { %s1419_s27 = scalar_lea.vmem %s27_s23, 128  ;;  %p1424_p11 = scmp.lt.s32.totalorder %s27_s23, %s27_s23 }
  0x1c   :  { %p1420_p10 = scmp.ne.s32.totalorder %s27_s23, %s1419_s27  ;;  %p1425_p12 = scmp.lt.s32.totalorder %s1419_s27, %s1419_s27 }
  0x1e   :  { %p1426_p13 = por %p1425_p12, %p1424_p11 }
  0x20   :  { %p1427_p0 = pnand %p1426_p13, %p1420_p10 }
  0x22   :  { %1430 = shalt.err (!%p1427_p0)
}
  0x23   :  { %29 = dma.hbm_to_vmem [thread:$0]  %s1751_s0, 128, %s27_s23, [#allocation4]  }
  0x24   :  { %s1526_s29 = smov [#allocation8]  }
  0x25   :  { %s49_s30 = sshll.u32 %s1526_s29, 4  ;;  %s50_s30 = int_to_ptr.vmem [resolvable:$true] %s49_s30 }
  0x26   :  { %s1439_s11 = scalar_lea.vmem %s50_s30, 512  ;;  %p1444_p2 = scmp.lt.s32.totalorder %s50_s30, %s50_s30 }
  0x27   :  { %p1440_p1 = scmp.ne.s32.totalorder %s50_s30, %s1439_s11  ;;  %p1445_p3 = scmp.lt.s32.totalorder %s1439_s11, %s1439_s11 }
  0x29   :  { %p1446_p4 = por %p1445_p3, %p1444_p2 }
  0x2b   :  { %p1447_p5 = pnand %p1446_p4, %p1440_p1 }
  0x2d   :  { %1450 = shalt.err (!%p1447_p5)
}
  0x2e   :  { %s1527_s4 = smov 128   ;;  %s1528_s12 = smov 8  }
  0x2f   :  { %55 = dma.hbm_to_vmem [thread:$0]  %s1754_s3, 512, %s50_s30, [#allocation7], %s1527_s4, %s1527_s4, %s1528_s12  }
  0x30   :  { %s1529_s15 = smov [#allocation11]   ;;  %s1530_s17 = smov [#allocation12]  }
  0x31   :  { %s75_s16 = sshll.u32 %s1529_s15, 4  ;;  %s89_s0 = sshll.u32 %s1530_s17, 4  ;;  %s76_s16 = int_to_ptr.vmem [resolvable:$true] %s75_s16  ;;  %s90_s0 = int_to_ptr.vmem [resolvable:$true] %s89_s0 }
  0x32   :  { %s1459_s18 = scalar_lea.vmem %s76_s16, 4096  ;;  %p1464_p7 = scmp.lt.s32.totalorder %s76_s16, %s76_s16 }
  0x33   :  { %p1460_p6 = scmp.ne.s32.totalorder %s76_s16, %s1459_s18  ;;  %p1465_p8 = scmp.lt.s32.totalorder %s1459_s18, %s1459_s18 }
  0x35   :  { %p1466_p9 = por %p1465_p8, %p1464_p7 }
  0x37   :  { %p1467_p10 = pnand %p1466_p9, %p1460_p6 }
  0x39   :  { %1470 = shalt.err (!%p1467_p10)
}
  0x3a   :  { %81 = dma.hbm_to_vmem [thread:$0]  %s1757_s6, 4096, %s76_s16, [#allocation10], %s1527_s4, %s1527_s4, %s1528_s12  }
  0x3b   :  { %s1479_s21 = scalar_lea.vmem %s90_s0, 2048  ;;  %p1484_p12 = scmp.lt.s32.totalorder %s90_s0, %s90_s0 }
  0x3c   :  { %p1480_p11 = scmp.ne.s32.totalorder %s90_s0, %s1479_s21  ;;  %p1485_p13 = scmp.lt.s32.totalorder %s1479_s21, %s1479_s21 }
  0x3e   :  { %p1486_p0 = por %p1485_p13, %p1484_p12 }
  0x40   :  { %p1487_p1 = pnand %p1486_p0, %p1480_p11 }
  0x42   :  { %1490 = shalt.err (!%p1487_p1)
}
  0x43   :  { %95 = dma.hbm_to_vmem [thread:$0]  %s1759_s8, 2048, %s90_s0, [#allocation13], %s1527_s4, %s1527_s4, %s1528_s12  }
  0x44   :  { %1511 = dma.done.wait [#allocation4], 128  }
  0x45   :  { %1512 = vsyncadd [#allocation4], 4294967168 }
  0x46   :  { %1513 = dma.done.wait [#allocation7], 4608  }
  0x47   :  { %1514 = vsyncadd [#allocation7], 4294962688 }
  0x48   :  { %1515 = dma.done.wait [#allocation10], 5120  }
  0x49   :  { %1516 = vsyncadd [#allocation10], 4294962176 }
  0x4a   :  { %1517 = dma.done.wait [#allocation13], 2048  }
  0x4b   :  { %1518 = vsyncadd [#allocation13], 4294965248  ;;  %v1531_v0 = vmov 0.0   ;;  %v148_v1 = vld [vmem:[#allocation6 + $0xf8] sm:$0xff]  ;;  %v147_v2 = vld [vmem:[#allocation6 + $0xf0] sm:$0xff]  ;;  %vm1532_vm0 = vmmov 0   ;;  %v151_v38 = vlaneseq }
  0x4c   :  { %225 = vmatprep.mubr.f32.mxu0 %v1531_v0  ;;  %1227 = vmatprep.subr.mxu1 %v1531_v0  ;;  %v146_v3 = vld [vmem:[#allocation6 + $0xe8] sm:$0xff]  ;;  %v145_v4 = vld [vmem:[#allocation6 + $0xe0] sm:$0xff]  ;;  %v144_v5 = vld [vmem:[#allocation6 + $0xd8] sm:$0xff]  ;;  %vm232_vm1 = vcmask 261120   ;;  %s1533_s23 = smov 32   ;;  %s1534_s24 = smov 96  }
  0x4d   :  { %161 = vmatprep.subr.mxu0 %v148_v1  ;;  %v143_v6 = vld [vmem:[#allocation6 + $0xd0] sm:$0xff]  ;;  %v142_v7 = vld [vmem:[#allocation6 + $0xc8] sm:$0xff]  ;;  %v141_v8 = vld [vmem:[#allocation6 + $0xc0] sm:$0xff]  ;;  %1235 = vmatprep.mubr.msk.f32.mxu1 %vm1532_vm0, %v1531_v0  ;;  %v1641_v39 = vshrl.u32 %v151_v38, 7  ;;  %s1536_s29 = smov [#allocation14]  }
  0x4e   :  { %162 = vmatpush1.msra.mxu0 %v147_v2  ;;  %v140_v9 = vld [vmem:[#allocation6 + $0xb8] sm:$0xff]  ;;  %v139_v10 = vld [vmem:[#allocation6 + $0xb0] sm:$0xff]  ;;  %v138_v11 = vld [vmem:[#allocation6 + $0xa8] sm:$0xff]  ;;  %s1118_s30 = sshll.u32 %s1536_s29, 4  ;;  %s1119_s30 = int_to_ptr.vmem [resolvable:$true] %s1118_s30 }
  0x4f   :  { %163 = vmatprep.subr.mxu0 %v146_v3  ;;  %v137_v12 = vld [vmem:[#allocation6 + $0xa0] sm:$0xff]  ;;  %v136_v13 = vld [vmem:[#allocation6 + $0x98] sm:$0xff]  ;;  %v135_v14 = vld [vmem:[#allocation6 + $0x90] sm:$0xff]  ;;  %v153_v40 = vsub.s32 0, %v1641_v39  ;;  %v157_v42 = vsub.s32 1, %v1641_v39  ;;  %s1491_s11 = scalar_lea.vmem %s1119_s30, 128  ;;  %p1496_p3 = scmp.lt.s32.totalorder %s1119_s30, %s1119_s30 }
  0x50   :  { %164 = vmatpush1.msra.mxu0 %v145_v4  ;;  %v134_v15 = vld [vmem:[#allocation6 + $0x88] sm:$0xff]  ;;  %v133_v16 = vld [vmem:[#allocation6 + $0x80] sm:$0xff]  ;;  %v132_v17 = vld [vmem:[#allocation6 + $0x78] sm:$0xff]  ;;  %p1492_p2 = scmp.ne.s32.totalorder %s1119_s30, %s1491_s11  ;;  %p1497_p4 = scmp.lt.s32.totalorder %s1491_s11, %s1491_s11 }
  0x51   :  { %165 = vmatprep.subr.mxu0 %v144_v5  ;;  %v131_v18 = vld [vmem:[#allocation6 + $0x70] sm:$0xff]  ;;  %v130_v19 = vld [vmem:[#allocation6 + $0x68] sm:$0xff]  ;;  %v129_v20 = vld [vmem:[#allocation6 + $0x60] sm:$0xff] }
  0x52   :  { %166 = vmatpush1.msra.mxu0 %v143_v6  ;;  %v128_v21 = vld [vmem:[#allocation6 + $0x58] sm:$0xff]  ;;  %v127_v22 = vld [vmem:[#allocation6 + $0x50] sm:$0xff]  ;;  %v126_v23 = vld [vmem:[#allocation6 + $0x48] sm:$0xff]  ;;  %p1498_p5 = por %p1497_p4, %p1496_p3 }
  0x53   :  { %167 = vmatprep.subr.mxu0 %v142_v7  ;;  %v125_v24 = vld [vmem:[#allocation6 + $0x40] sm:$0xff]  ;;  %v124_v25 = vld [vmem:[#allocation6 + $0x38] sm:$0xff]  ;;  %v123_v26 = vld [vmem:[#allocation6 + $0x30] sm:$0xff] }
  0x54   :  { %168 = vmatpush1.msra.mxu0 %v141_v8  ;;  %v122_v27 = vld [vmem:[#allocation6 + $0x28] sm:$0xff]  ;;  %v121_v28 = vld [vmem:[#allocation6 + $0x20] sm:$0xff]  ;;  %v120_v29 = vld [vmem:[#allocation6 + $0x18] sm:$0xff]  ;;  %p1499_p6 = pnand %p1498_p5, %p1492_p2 }
  0x55   :  { %169 = vmatprep.subr.mxu0 %v140_v9  ;;  %v119_v30 = vld [vmem:[#allocation6 + $0x10] sm:$0xff]  ;;  %v118_v31 = vld [vmem:[#allocation6 + $0x8] sm:$0xff]  ;;  %v117_v32 = vld [vmem:[#allocation6] sm:$0xff] }
  0x56   :  { %170 = vmatpush1.msra.mxu0 %v139_v10  ;;  %v116_v33 = vld [vmem:[#allocation3] sm:$0xff]  ;;  %v1615_v35 = vld [vmem:[#allocation8 + $0x10] sm:$0xff]  ;;  %v1621_v36 = vld [vmem:[#allocation8 + $0x8] sm:$0xff] }
  0x57   :  { %171 = vmatprep.subr.mxu0 %v138_v11  ;;  %v1613_v34 = vld [vmem:[#allocation8 + $0x18] sm:$0xff]  ;;  %v1627_v37 = vld [vmem:[#allocation8] sm:$0xff]  ;;  %v1020_v39 = vld [vmem:[#allocation12 + $0x10] sm:$0xff] }
  0x58   :  { %172 = vmatpush1.msra.mxu0 %v137_v12  ;;  %1228 = vmatpush3.msra.mxu1 %v1613_v34  ;;  %v149_v41 = vld [vmem:[%s1753_s2] sm:$0x3]  ;;  %s1535_s2 = smov 64   ;;  %v934_v38 = vld [vmem:[#allocation11 + $0xe0] sm:$0xff] }
  0x59   :  { %173 = vmatprep.subr.mxu0 %v136_v13  ;;  %1229 = vmatprep.subr.mxu1 %v1531_v0  ;;  %v154_v43 = vrot.slane %v149_v41, %v153_v40  ;;  %v158_v44 = vrot.slane %v149_v41, %v157_v42  ;;  %v918_v41 = vld [vmem:[#allocation11 + $0x60] sm:$0xff] }
  0x5a   :  { %174 = vmatpush1.msra.mxu0 %v135_v14  ;;  %1230 = vmatpush3.msra.mxu1 %v1615_v35 }
  0x5b   :  { %175 = vmatprep.subr.mxu0 %v134_v15  ;;  %1231 = vmatprep.subr.mxu1 %v1531_v0 }
  0x5c   :  { %176 = vmatpush1.msra.mxu0 %v133_v16  ;;  %1232 = vmatpush3.msra.mxu1 %v1621_v36 }
  0x5d   :  { %177 = vmatprep.subr.mxu0 %v132_v17  ;;  %1233 = vmatprep.subr.mxu1 %v1531_v0 }
  0x5e   :  { %178 = vmatpush1.msra.mxu0 %v131_v18  ;;  %1234 = vmatpush3.msra.mxu1 %v1627_v37 }
  0x5f   :  { %179 = vmatprep.subr.mxu0 %v130_v19  ;;  %1238 = vmatprep.subr.mxu1 %v1531_v0 }
  0x60   :  { %180 = vmatpush1.msra.mxu0 %v129_v20 }
  0x61   :  { %181 = vmatprep.subr.mxu0 %v128_v21 }
  0x62   :  { %182 = vmatpush1.msra.mxu0 %v127_v22 }
  0x63   :  { %183 = vmatprep.subr.mxu0 %v126_v23 }
  0x64   :  { %184 = vmatpush1.msra.mxu0 %v125_v24  ;;  %v813_v24 = vld [vmem:[#allocation9 + $0x38] sm:$0xff] }
  0x65   :  { %185 = vmatprep.subr.mxu0 %v124_v25  ;;  %v812_v25 = vld [vmem:[#allocation9 + $0x30] sm:$0xff] }
  0x66   :  { %186 = vmatpush1.msra.mxu0 %v123_v26  ;;  %v811_v26 = vld [vmem:[#allocation9 + $0x28] sm:$0xff] }
  0x67   :  { %187 = vmatprep.subr.mxu0 %v122_v27  ;;  %v810_v27 = vld [vmem:[#allocation9 + $0x20] sm:$0xff] }
  0x68   :  { %188 = vmatpush1.msra.mxu0 %v121_v28  ;;  %v809_v28 = vld [vmem:[#allocation9 + $0x18] sm:$0xff] }
  0x69   :  { %189 = vmatprep.subr.mxu0 %v120_v29  ;;  %v808_v29 = vld [vmem:[#allocation9 + $0x10] sm:$0xff] }
  0x6a   :  { %190 = vmatpush1.msra.mxu0 %v119_v30  ;;  %v807_v30 = vld [vmem:[#allocation9 + $0x8] sm:$0xff] }
  0x6b   :  { %191 = vmatprep.subr.mxu0 %v118_v31  ;;  %v806_v31 = vld [vmem:[#allocation9] sm:$0xff] }
  0x6c   :  { %192 = vmatpush1.msra.mxu0 %v117_v32  ;;  %v937_v32 = vld [vmem:[#allocation11 + $0xf8] sm:$0xff] }
  0x6d   :  { %226 = vmatmul.mubr.f32.vlgmr.msra.gmra.mxu0 %v116_v33  ;;  %1271 = vmatprep.subr.mxu0 %v1531_v0  ;;  %v921_v33 = vld [vmem:[#allocation11 + $0x78] sm:$0xff] }
  0x6e   :  { %1272 = vmatpush3.msra.mxu0 %v1613_v34  ;;  %1279 = vmatprep.mubr.msk.f32.mxu0 %vm1532_vm0, %v1531_v0 }
  0x6f   :  { %1273 = vmatprep.subr.mxu0 %v1531_v0 }
  0x70   :  { %1274 = vmatpush3.msra.mxu0 %v1615_v35 }
  0x71   :  { %1275 = vmatprep.subr.mxu0 %v1531_v0 }
  0x72   :  { %1276 = vmatpush3.msra.mxu0 %v1621_v36 }
  0x73   :  { %1277 = vmatprep.subr.mxu0 %v1531_v0 }
  0x74   :  { %1278 = vmatpush3.msra.mxu0 %v1627_v37 }
  0x75   :  { %1293 = vmatprep.subr.mxu0 %v1531_v0 }
 0x12d   :  { %v227_v45 = vpop.f32.mrf.mxu0 }
 0x12e   :  { %v228_v46 = vadd.f32 %v227_v45, %v154_v43  ;;  %v933_v43 = vld [vmem:[#allocation11 + $0xd8] sm:$0xff]  ;;  %v932_v45 = vld [vmem:[#allocation11 + $0xd0] sm:$0xff] }
 0x12f   :  { %v229_v47 = vpop.f32.mrf.mxu0 }
 0x130   :  { %233 = vst.msk [vmem:[#allocation2] sm:$0xff] %vm232_vm1, %v228_v46  ;;  %v230_v48 = vadd.f32 %v229_v47, %v158_v44  ;;  %245 = vrot.lane.b32.xlu1 %v228_v46, %s1533_s23  ;;  %235 = vrot.lane.b32.xlu0 %v228_v46, %s1534_s24  ;;  %v917_v44 = vld [vmem:[#allocation11 + $0x58] sm:$0xff]  ;;  %v931_v47 = vld [vmem:[#allocation11 + $0xc8] sm:$0xff] }
 0x132   :  { %251 = vst.msk [vmem:[#allocation2 + $0x20] sm:$0xff] %vm232_vm1, %v230_v48 }
 0x134   :  { %253 = vrot.lane.b32.xlu1 %v230_v48, %s1534_s24  ;;  %240 = vrot.lane.b32.xlu0 %v228_v46, %s1535_s2  ;;  %v916_v46 = vld [vmem:[#allocation11 + $0x50] sm:$0xff] }
 0x137   :  { %v272_v49 = vld [vmem:[#allocation2] sm:$0xff] }
 0x138   :  { %1355 = vtanh.f32 %v272_v49  ;;  %263 = vrot.lane.b32.xlu1 %v230_v48, %s1533_s23  ;;  %258 = vrot.lane.b32.xlu0 %v230_v48, %s1535_s2  ;;  %v915_v48 = vld [vmem:[#allocation11 + $0x48] sm:$0xff]  ;;  %v930_v49 = vld [vmem:[#allocation11 + $0xc0] sm:$0xff] }
 0x139   :  { %v502_v9 = vld [vmem:[#allocation2 + $0x20] sm:$0xff] }
 0x145   :  { %v1356_v50 = vpop.eup %1355 }
 0x146   :  { %1236 = vmatmul.mubr.msk.f32.vlgmr.msra.gmra.mxu1 %vm232_vm1, %v1356_v50  ;;  %v914_v50 = vld [vmem:[#allocation11 + $0x40] sm:$0xff] }
 0x147   :  { %1239 = vmatpush3.msra.mxu1 %v1613_v34  ;;  %1246 = vmatprep.mubr.msk.f32.mxu1 %vm1532_vm0, %v1531_v0 }
 0x148   :  { %1240 = vmatprep.subr.mxu1 %v1531_v0 }
 0x149   :  { %1241 = vmatpush3.msra.mxu1 %v1615_v35 }
 0x14a   :  { %1242 = vmatprep.subr.mxu1 %v1531_v0 }
 0x14b   :  { %1243 = vmatpush3.msra.mxu1 %v1621_v36 }
 0x14c   :  { %1244 = vmatprep.subr.mxu1 %v1531_v0 }
 0x14d   :  { %1245 = vmatpush3.msra.mxu1 %v1627_v37 }
 0x14e   :  { %1249 = vmatprep.subr.mxu1 %v1531_v0 }
 0x1a2   :  { %v246_v51 = vpop.permute.xlu1 %245  ;;  %v236_v52 = vpop.permute.xlu0 %235 }
 0x1a3   :  { %249 = vst.msk [vmem:[#allocation2 + $0x18] sm:$0xff] %vm232_vm1, %v246_v51  ;;  %239 = vst.msk [vmem:[#allocation2 + $0x8] sm:$0xff] %vm232_vm1, %v236_v52  ;;  %v929_v51 = vld [vmem:[#allocation11 + $0xb8] sm:$0xff] }
 0x1a4   :  { %v913_v52 = vld [vmem:[#allocation11 + $0x38] sm:$0xff] }
 0x1a6   :  { %v254_v53 = vpop.permute.xlu1 %253  ;;  %v241_v54 = vpop.permute.xlu0 %240 }
 0x1a7   :  { %257 = vst.msk [vmem:[#allocation2 + $0x28] sm:$0xff] %vm232_vm1, %v254_v53  ;;  %244 = vst.msk [vmem:[#allocation2 + $0x10] sm:$0xff] %vm232_vm1, %v241_v54  ;;  %v928_v53 = vld [vmem:[#allocation11 + $0xb0] sm:$0xff] }
 0x1a8   :  { %v912_v54 = vld [vmem:[#allocation11 + $0x30] sm:$0xff] }
 0x1aa   :  { %v264_v55 = vpop.permute.xlu1 %263  ;;  %v259_v56 = vpop.permute.xlu0 %258  ;;  %v274_v57 = vld [vmem:[#allocation2 + $0x8] sm:$0xff]  ;;  %v426_v4 = vld [vmem:[#allocation2 + $0x18] sm:$0xff] }
 0x1ab   :  { %267 = vst.msk [vmem:[#allocation2 + $0x38] sm:$0xff] %vm232_vm1, %v264_v55  ;;  %262 = vst.msk [vmem:[#allocation2 + $0x30] sm:$0xff] %vm232_vm1, %v259_v56  ;;  %v927_v55 = vld [vmem:[#allocation11 + $0xa8] sm:$0xff] }
 0x1ac   :  { %v911_v56 = vld [vmem:[#allocation11 + $0x28] sm:$0xff] }
 0x1ae   :  { %v350_v62 = vld [vmem:[#allocation2 + $0x10] sm:$0xff]  ;;  %v578_v14 = vld [vmem:[#allocation2 + $0x28] sm:$0xff] }
 0x1b2   :  { %v654_v19 = vld [vmem:[#allocation2 + $0x30] sm:$0xff] }
 0x206   :  { %v344_v58 = vpop.f32.mrf.mxu1 }
 0x207   :  { %v348_v59 = vadd.f32 %v344_v58, %v274_v57  ;;  %v926_v57 = vld [vmem:[#allocation11 + $0xa0] sm:$0xff]  ;;  %v730_v58 = vld [vmem:[#allocation2 + $0x38] sm:$0xff] }
 0x208   :  { %v1237_v60 = vpop.f32.mrf.mxu1 }
 0x209   :  { %1357 = vtanh.f32 %v348_v59 }
 0x216   :  { %v1358_v61 = vpop.eup %1357 }
 0x217   :  { %1247 = vmatmul.mubr.msk.f32.vlgmr.msra.gmra.mxu1 %vm232_vm1, %v1358_v61 }
 0x218   :  { %1250 = vmatpush3.msra.mxu1 %v1613_v34  ;;  %1257 = vmatprep.mubr.msk.f32.mxu1 %vm1532_vm0, %v1531_v0 }
 0x219   :  { %1251 = vmatprep.subr.mxu1 %v1531_v0 }
 0x21a   :  { %1252 = vmatpush3.msra.mxu1 %v1615_v35 }
 0x21b   :  { %1253 = vmatprep.subr.mxu1 %v1531_v0 }
 0x21c   :  { %1254 = vmatpush3.msra.mxu1 %v1621_v36 }
 0x21d   :  { %1255 = vmatprep.subr.mxu1 %v1531_v0 }
 0x21e   :  { %1256 = vmatpush3.msra.mxu1 %v1627_v37 }
 0x21f   :  { %1260 = vmatprep.subr.mxu1 %v1531_v0 }
 0x2d7   :  { %v420_v63 = vpop.f32.mrf.mxu1 }
 0x2d8   :  { %v424_v1 = vadd.f32 %v420_v63, %v350_v62  ;;  %v910_v63 = vld [vmem:[#allocation11 + $0x20] sm:$0xff] }
 0x2d9   :  { %v1248_v2 = vpop.f32.mrf.mxu1 }
 0x2da   :  { %1359 = vtanh.f32 %v424_v1  ;;  %v925_v1 = vld [vmem:[#allocation11 + $0x98] sm:$0xff] }
 0x2db   :  { %v909_v2 = vld [vmem:[#allocation11 + $0x18] sm:$0xff] }
 0x2e7   :  { %v1360_v3 = vpop.eup %1359 }
 0x2e8   :  { %1258 = vmatmul.mubr.msk.f32.vlgmr.msra.gmra.mxu1 %vm232_vm1, %v1360_v3  ;;  %v924_v3 = vld [vmem:[#allocation11 + $0x90] sm:$0xff] }
 0x2e9   :  { %1261 = vmatpush3.msra.mxu1 %v1613_v34  ;;  %1268 = vmatprep.mubr.msk.f32.mxu1 %vm1532_vm0, %v1531_v0 }
 0x2ea   :  { %1262 = vmatprep.subr.mxu1 %v1531_v0 }
 0x2eb   :  { %1263 = vmatpush3.msra.mxu1 %v1615_v35 }
 0x2ec   :  { %1264 = vmatprep.subr.mxu1 %v1531_v0 }
 0x2ed   :  { %1265 = vmatpush3.msra.mxu1 %v1621_v36 }
 0x2ee   :  { %1266 = vmatprep.subr.mxu1 %v1531_v0 }
 0x2ef   :  { %1267 = vmatpush3.msra.mxu1 %v1627_v37 }
 0x2f0   :  { %1282 = vmatprep.subr.mxu1 %v1531_v0 }
 0x3a8   :  { %v496_v5 = vpop.f32.mrf.mxu1 }
 0x3a9   :  { %v500_v6 = vadd.f32 %v496_v5, %v426_v4  ;;  %v908_v4 = vld [vmem:[#allocation11 + $0x10] sm:$0xff]  ;;  %v923_v5 = vld [vmem:[#allocation11 + $0x88] sm:$0xff] }
 0x3aa   :  { %v1259_v7 = vpop.f32.mrf.mxu1 }
 0x3ab   :  { %1361 = vtanh.f32 %v500_v6  ;;  %v907_v6 = vld [vmem:[#allocation11 + $0x8] sm:$0xff]  ;;  %v922_v7 = vld [vmem:[#allocation11 + $0x80] sm:$0xff] }
 0x3b8   :  { %v1362_v8 = vpop.eup %1361 }
 0x3b9   :  { %1269 = vmatmul.mubr.msk.f32.vlgmr.msra.gmra.mxu1 %vm232_vm1, %v1362_v8  ;;  %v906_v8 = vld [vmem:[#allocation11] sm:$0xff] }
 0x3ba   :  { %1283 = vmatpush3.msra.mxu1 %v1613_v34  ;;  %1290 = vmatprep.mubr.msk.f32.mxu1 %vm1532_vm0, %v1531_v0 }
 0x3bb   :  { %1284 = vmatprep.subr.mxu1 %v1531_v0 }
 0x3bc   :  { %1285 = vmatpush3.msra.mxu1 %v1615_v35 }
 0x3bd   :  { %1286 = vmatprep.subr.mxu1 %v1531_v0 }
 0x3be   :  { %1287 = vmatpush3.msra.mxu1 %v1621_v36 }
 0x3bf   :  { %1288 = vmatprep.subr.mxu1 %v1531_v0 }
 0x3c0   :  { %1289 = vmatpush3.msra.mxu1 %v1627_v37 }
 0x3c1   :  { %853 = vmatprep.subr.mxu1 %v813_v24 }
 0x479   :  { %v572_v10 = vpop.f32.mrf.mxu1 }
 0x47a   :  { %v576_v11 = vadd.f32 %v572_v10, %v502_v9  ;;  %v1033_v9 = vld [vmem:[#allocation12 + $0x78] sm:$0xff]  ;;  %v1032_v10 = vld [vmem:[#allocation12 + $0x70] sm:$0xff] }
 0x47b   :  { %v1270_v12 = vpop.f32.mrf.mxu1 }
 0x47c   :  { %1363 = vtanh.f32 %v576_v11  ;;  %v1031_v11 = vld [vmem:[#allocation12 + $0x68] sm:$0xff]  ;;  %v1030_v12 = vld [vmem:[#allocation12 + $0x60] sm:$0xff] }
 0x489   :  { %v1364_v13 = vpop.eup %1363 }
 0x48a   :  { %1280 = vmatmul.mubr.msk.f32.vlgmr.msra.gmra.mxu0 %vm232_vm1, %v1364_v13  ;;  %v1029_v13 = vld [vmem:[#allocation12 + $0x58] sm:$0xff] }
 0x48b   :  { %1294 = vmatpush3.msra.mxu0 %v1613_v34  ;;  %1301 = vmatprep.mubr.msk.f32.mxu0 %vm1532_vm0, %v1531_v0  ;;  %v936_v34 = vld [vmem:[#allocation11 + $0xf0] sm:$0xff] }
 0x48c   :  { %1295 = vmatprep.subr.mxu0 %v1531_v0 }
 0x48d   :  { %1296 = vmatpush3.msra.mxu0 %v1615_v35  ;;  %v920_v35 = vld [vmem:[#allocation11 + $0x70] sm:$0xff] }
 0x48e   :  { %1297 = vmatprep.subr.mxu0 %v1531_v0 }
 0x48f   :  { %1298 = vmatpush3.msra.mxu0 %v1621_v36  ;;  %v935_v36 = vld [vmem:[#allocation11 + $0xe8] sm:$0xff] }
 0x490   :  { %1299 = vmatprep.subr.mxu0 %v1531_v0 }
 0x491   :  { %1300 = vmatpush3.msra.mxu0 %v1627_v37  ;;  %v919_v37 = vld [vmem:[#allocation11 + $0x68] sm:$0xff] }
 0x492   :  { %1175 = vmatprep.subr.mxu0 %v937_v32  ;;  %v1018_v32 = vld [vmem:[#allocation12] sm:$0xff] }
 0x54a   :  { %v648_v15 = vpop.f32.mrf.mxu0 }
 0x54b   :  { %v652_v16 = vadd.f32 %v648_v15, %v578_v14  ;;  %v1028_v14 = vld [vmem:[#allocation12 + $0x50] sm:$0xff]  ;;  %v1027_v15 = vld [vmem:[#allocation12 + $0x48] sm:$0xff] }
 0x54c   :  { %v1281_v17 = vpop.f32.mrf.mxu0 }
 0x54d   :  { %1365 = vtanh.f32 %v652_v16  ;;  %v1026_v16 = vld [vmem:[#allocation12 + $0x40] sm:$0xff]  ;;  %v1025_v17 = vld [vmem:[#allocation12 + $0x38] sm:$0xff] }
 0x55a   :  { %v1366_v18 = vpop.eup %1365 }
 0x55b   :  { %1291 = vmatmul.mubr.msk.f32.vlgmr.msra.gmra.mxu1 %vm232_vm1, %v1366_v18  ;;  %v1024_v18 = vld [vmem:[#allocation12 + $0x30] sm:$0xff] }
 0x55c   :  { %893 = vmatprep.mubr.f32.mxu1 %v1531_v0  ;;  %854 = vmatpush1.msra.mxu1 %v812_v25 }
 0x55d   :  { %855 = vmatprep.subr.mxu1 %v811_v26 }
 0x55e   :  { %856 = vmatpush1.msra.mxu1 %v810_v27 }
 0x55f   :  { %857 = vmatprep.subr.mxu1 %v809_v28 }
 0x560   :  { %858 = vmatpush1.msra.mxu1 %v808_v29 }
 0x561   :  { %859 = vmatprep.subr.mxu1 %v807_v30 }
 0x562   :  { %860 = vmatpush1.msra.mxu1 %v806_v31  ;;  %v1022_v31 = vld [vmem:[#allocation12 + $0x20] sm:$0xff] }
 0x563   :  { %1304 = vmatprep.subr.mxu1 %v1531_v0 }
 0x61b   :  { %v724_v20 = vpop.f32.mrf.mxu1 }
 0x61c   :  { %v728_v21 = vadd.f32 %v724_v20, %v654_v19  ;;  %v1023_v19 = vld [vmem:[#allocation12 + $0x28] sm:$0xff]  ;;  %v814_v20 = vld [vmem:[%s1756_s5] sm:$0x3] }
 0x61d   :  { %v1292_v22 = vpop.f32.mrf.mxu1 }
 0x61e   :  { %1367 = vtanh.f32 %v728_v21  ;;  %v819_v21 = vrot.slane %v814_v20, %v153_v40  ;;  %v823_v22 = vrot.slane %v814_v20, %v157_v42  ;;  %v1021_v40 = vld [vmem:[#allocation12 + $0x18] sm:$0xff]  ;;  %v1019_v42 = vld [vmem:[#allocation12 + $0x8] sm:$0xff] }
 0x62b   :  { %v1368_v23 = vpop.eup %1367 }
 0x62c   :  { %1302 = vmatmul.mubr.msk.f32.vlgmr.msra.gmra.mxu0 %vm232_vm1, %v1368_v23 }
 0x62d   :  { %1176 = vmatpush3.msra.mxu0 %v921_v33 }
 0x62e   :  { %1177 = vmatprep.subr.mxu0 %v936_v34  ;;  %v1138_v34 = vld [vmem:[%s1758_s7] ss:$0 sm:$0xff] }
 0x62f   :  { %1178 = vmatpush3.msra.mxu0 %v920_v35 }
 0x630   :  { %1179 = vmatprep.subr.mxu0 %v935_v36 }
 0x631   :  { %1180 = vmatpush3.msra.mxu0 %v919_v37 }
 0x632   :  { %1181 = vmatprep.subr.mxu0 %v934_v38 }
 0x633   :  { %1182 = vmatpush3.msra.mxu0 %v918_v41 }
 0x634   :  { %1183 = vmatprep.subr.mxu0 %v933_v43  ;;  %v1139_v43 = vld [vmem:[%s1760_s9] ss:$0 sm:$0xff] }
 0x635   :  { %1184 = vmatpush3.msra.mxu0 %v917_v44 }
 0x636   :  { %1185 = vmatprep.subr.mxu0 %v932_v45 }
 0x637   :  { %1186 = vmatpush3.msra.mxu0 %v916_v46 }
 0x638   :  { %1187 = vmatprep.subr.mxu0 %v931_v47 }
 0x639   :  { %1188 = vmatpush3.msra.mxu0 %v915_v48 }
 0x63a   :  { %1189 = vmatprep.subr.mxu0 %v930_v49 }
 0x63b   :  { %1190 = vmatpush3.msra.mxu0 %v914_v50 }
 0x63c   :  { %1191 = vmatprep.subr.mxu0 %v929_v51 }
 0x63d   :  { %1192 = vmatpush3.msra.mxu0 %v913_v52 }
 0x63e   :  { %1193 = vmatprep.subr.mxu0 %v928_v53 }
 0x63f   :  { %1194 = vmatpush3.msra.mxu0 %v912_v54 }
 0x640   :  { %1195 = vmatprep.subr.mxu0 %v927_v55 }
 0x641   :  { %1196 = vmatpush3.msra.mxu0 %v911_v56 }
 0x642   :  { %1197 = vmatprep.subr.mxu0 %v926_v57 }
 0x643   :  { %1198 = vmatpush3.msra.mxu0 %v910_v63 }
 0x644   :  { %1199 = vmatprep.subr.mxu0 %v925_v1 }
 0x645   :  { %1200 = vmatpush3.msra.mxu0 %v909_v2 }
 0x646   :  { %1201 = vmatprep.subr.mxu0 %v924_v3 }
 0x647   :  { %1202 = vmatpush3.msra.mxu0 %v908_v4 }
 0x648   :  { %1203 = vmatprep.subr.mxu0 %v923_v5 }
 0x649   :  { %1204 = vmatpush3.msra.mxu0 %v907_v6 }
 0x64a   :  { %1205 = vmatprep.subr.mxu0 %v922_v7 }
 0x64b   :  { %1206 = vmatpush3.msra.mxu0 %v906_v8 }
 0x6ec   :  { %v800_v59 = vpop.f32.mrf.mxu0 }
 0x6ed   :  { %v804_v60 = vadd.f32 %v800_v59, %v730_v58 }
 0x6ee   :  { %v1303_v61 = vpop.f32.mrf.mxu0 }
 0x6ef   :  { %1369 = vtanh.f32 %v804_v60 }
 0x6fc   :  { %v1370_v62 = vpop.eup %1369 }
 0x6fd   :  { %1137 = vmatmul.mubr.msk.f32.vlgmr.msra.gmra.mxu1 %vm232_vm1, %v1370_v62 }
 0x6fe   :  { %1336 = vmatprep.mubr.msk.f32.mxu1 %vm1532_vm0, %v1531_v0  ;;  %1305 = vmatpush3.msra.mxu1 %v1033_v9 }
 0x6ff   :  { %1306 = vmatprep.subr.mxu1 %v1531_v0 }
 0x700   :  { %1307 = vmatpush3.msra.mxu1 %v1032_v10 }
 0x701   :  { %1308 = vmatprep.subr.mxu1 %v1531_v0 }
 0x702   :  { %1309 = vmatpush3.msra.mxu1 %v1031_v11 }
 0x703   :  { %1310 = vmatprep.subr.mxu1 %v1531_v0 }
 0x704   :  { %1311 = vmatpush3.msra.mxu1 %v1030_v12 }
 0x705   :  { %1312 = vmatprep.subr.mxu1 %v1531_v0 }
 0x706   :  { %1313 = vmatpush3.msra.mxu1 %v1029_v13 }
 0x707   :  { %1314 = vmatprep.subr.mxu1 %v1531_v0 }
 0x708   :  { %1315 = vmatpush3.msra.mxu1 %v1028_v14 }
 0x709   :  { %1316 = vmatprep.subr.mxu1 %v1531_v0 }
 0x70a   :  { %1317 = vmatpush3.msra.mxu1 %v1027_v15 }
 0x70b   :  { %1318 = vmatprep.subr.mxu1 %v1531_v0 }
 0x70c   :  { %1319 = vmatpush3.msra.mxu1 %v1026_v16 }
 0x70d   :  { %1320 = vmatprep.subr.mxu1 %v1531_v0 }
 0x70e   :  { %1321 = vmatpush3.msra.mxu1 %v1025_v17 }
 0x70f   :  { %1322 = vmatprep.subr.mxu1 %v1531_v0 }
 0x710   :  { %1323 = vmatpush3.msra.mxu1 %v1024_v18 }
 0x711   :  { %1324 = vmatprep.subr.mxu1 %v1531_v0 }
 0x712   :  { %1325 = vmatpush3.msra.mxu1 %v1023_v19 }
 0x713   :  { %1326 = vmatprep.subr.mxu1 %v1531_v0 }
 0x714   :  { %1327 = vmatpush3.msra.mxu1 %v1022_v31 }
 0x715   :  { %1328 = vmatprep.subr.mxu1 %v1531_v0 }
 0x716   :  { %1329 = vmatpush3.msra.mxu1 %v1021_v40 }
 0x717   :  { %1330 = vmatprep.subr.mxu1 %v1531_v0 }
 0x718   :  { %1331 = vmatpush3.msra.mxu1 %v1020_v39 }
 0x719   :  { %1332 = vmatprep.subr.mxu1 %v1531_v0 }
 0x71a   :  { %1333 = vmatpush3.msra.mxu1 %v1019_v42 }
 0x71b   :  { %1334 = vmatprep.subr.mxu1 %v1531_v0 }
 0x71c   :  { %1335 = vmatpush3.msra.mxu1 %v1018_v32 }
 0x7bd   :  { %v895_v23 = vpop.f32.mrf.mxu1 }
 0x7be   :  { %v896_v24 = vadd.f32 %v895_v23, %v819_v21 }
 0x7bf   :  { %v897_v25 = vpop.f32.mrf.mxu1 }
 0x7c0   :  { %v898_v26 = vadd.f32 %v897_v25, %v823_v22  ;;  %v902_v27 = vmul.f32 0.2, %v896_v24  ;;  %vm900_vm2 = vcmp.ge.f32.partialorder %v896_v24, 0.0 }
 0x7c2   :  { %v903_v28 = vmul.f32 0.2, %v898_v26  ;;  %vm901_vm3 = vcmp.ge.f32.partialorder %v898_v26, 0.0  ;;  %v904_v30 = vsel %vm900_vm2, %v896_v24, %v902_v27 }
 0x7c4   :  { %v905_v29 = vsel %vm901_vm3, %v898_v26, %v903_v28 }
 0x7c5   :  { %1009 = vmatprep.mubr.f32.mxu0 %v905_v29 }
 0x7c6   :  { %1010 = vmatmul.mubr.f32.vlgmr.msra.gmra.mxu0 %v904_v30 }
 0x886   :  { %v1207_v33 = vpop.f32.mrf.mxu0 }
 0x888   :  { %v1208_v35 = vpop.f32.mrf.mxu0 }
 0x889   :  { %v1209_v36 = vadd.f32 %v1208_v35, %v1207_v33 }
 0x88b   :  { %v1012_v37 = vadd.f32 %v1209_v36, %v1138_v34 }
 0x88d   :  { %v1016_v38 = vmul.f32 0.2, %v1012_v37  ;;  %vm1015_vm4 = vcmp.ge.f32.partialorder %v1012_v37, 0.0 }
 0x88f   :  { %v1017_v41 = vsel %vm1015_vm4, %v1012_v37, %v1016_v38 }
 0x890   :  { %1337 = vmatmul.mubr.f32.vlgmr.msra.gmra.mxu1 %v1017_v41 }
 0x950   :  { %v1107_v0 = vpop.f32.mrf.mxu1 }
 0x951   :  { %v1108_v44 = vadd.f32 %v1139_v43, %v1107_v0 }
 0x952   :  { %v1338_v45 = vpop.f32.mrf.mxu1 }
 0x953   :  { %1111 = vst [vmem:[#allocation14] sm:$0xff] %v1108_v44 }
 0x954   :  { %1502 = shalt.err (!%p1499_p6)
}
 0x955   :  { %1121 = dma.vmem_to_hbm [thread:$0]  %s1119_s30, 128, %s1761_s10, [#allocation5]  }
 0x956   :  { %1519 = dma.done.wait [#allocation5], 128  }
 0x957   :  { %1520 = vsyncadd [#allocation5], 4294967168 }
 0x958   :  { %1125 = vsyncpa [#allocation4], 1 }
 0x959   :  { %1126 = vsyncpa [#allocation7], 1 }
 0x95a   :  { %1127 = vsyncpa [#allocation10], 1 }
 0x95b   :  { %1128 = vsyncpa [#allocation13], 1 }
 0x95c   :  { %1129 = vsyncpa [#allocation5], 1 }

</bundles_post_ra>
